<compile_context>
chip_gen: v7x
topology: tpu7x:2x2x1
jax: 0.10.0
libtpu: 0.0.40
codegen_flags: <defaults>
</compile_context>

<pallas_src>
import jax
import jax.numpy as jnp
from jax.experimental import pallas as pl
from jax.experimental.pallas import tpu as pltpu


def se_kernel(x_ref, w1t_ref, w2t_ref, o_ref):
    # x_ref / o_ref: (Nb, HW, C)  channels-last slab for Nb samples
    # w1t_ref:       (C, C_red)   fc1 weight, pre-transposed
    # w2t_ref:       (C_red, C)   fc2 weight, pre-transposed
    hw = x_ref.shape[1]

    # AdaptiveAvgPool2d(1): mean over the spatial (sublane) axis, f32 accumulation.
    pooled = jnp.sum(x_ref[...].astype(jnp.float32), axis=1) * (1.0 / hw)   # (Nb, C)

    # fc1 (1x1 conv, no bias) + ReLU
    h = jnp.dot(pooled, w1t_ref[...].astype(jnp.float32),
                preferred_element_type=jnp.float32)                          # (Nb, C_red)
    h = jnp.maximum(h, 0.0)

    # fc2 (1x1 conv, no bias) + Sigmoid (exact; operates on the tiny (Nb, C) tensor)
    s = jnp.dot(h, w2t_ref[...].astype(jnp.float32),
                preferred_element_type=jnp.float32)                          # (Nb, C)
    s = 1.0 / (1.0 + jnp.exp(-s))

    # Re-read x for the final scale so no f32 copy of the full slab is live
    # across the FC/sigmoid; multiply in the I/O dtype (sublane broadcast over HW).
    o_ref[...] = x_ref[...] * s.astype(o_ref.dtype)[:, None, :]


# Conservative, generation-agnostic VMEM budgeting: per grid step the pipeline
# keeps (x block + out block) x 2 buffers in VMEM (~4x one block), plus the
# tiny FC weights.  An 8 MiB block keeps buffer usage near 32 MiB, safely
# inside the 48 MiB limit requested below on v5e/v6e (128 MiB physical) and
# v7x (64 MiB physical per TensorCore).
_BLOCK_BUDGET_BYTES = 8 * 1024 * 1024
_VMEM_LIMIT_BYTES = 48 * 1024 * 1024


def _pick_batch_block(n, per_sample_bytes):
    """Largest divisor of n that fits the block budget and keeps grid >= 2."""
    cap = max(1, _BLOCK_BUDGET_BYTES // per_sample_bytes)
    if n >= 2:
        cap = min(cap, n // 2)   # >= 2 grid steps: 2 TCs on v7x + pipelining
    cap = max(1, min(cap, n))
    return max(d for d in range(1, cap + 1) if n % d == 0)


def se_module(x_nchw, w1, w2):
    """x_nchw: (N, C, H, W); w1: (C_red, C, 1, 1); w2: (C, C_red, 1, 1)."""
    N, C, H, W = x_nchw.shape
    HW = H * W
    C_red = w1.shape[0]
    dtype_bytes = jnp.dtype(x_nchw.dtype).itemsize

    # Channels-last slab (layout plumbing done by XLA outside the kernel).
    x = jnp.transpose(x_nchw, (0, 2, 3, 1)).reshape(N, HW, C)
    w1t = w1.reshape(C_red, C).T            # (C, C_red)
    w2t = w2.reshape(C, C_red).T            # (C_red, C)

    nb = _pick_batch_block(N, HW * C * dtype_bytes)
    grid = (N // nb,)

    cost = pl.CostEstimate(
        flops=2 * N * HW * C + 4 * N * C * C_red,
        transcendentals=N * C,
        bytes_accessed=2 * N * HW * C * dtype_bytes + 2 * C * C_red * 4,
    )

    out = pl.pallas_call(
        se_kernel,
        out_shape=jax.ShapeDtypeStruct((N, HW, C), x.dtype),
        grid_spec=pltpu.PrefetchScalarGridSpec(
            num_scalar_prefetch=0,
            grid=grid,
            in_specs=[
                pl.BlockSpec((nb, HW, C), lambda n: (n, 0, 0)),
                pl.BlockSpec((C, C_red), lambda n: (0, 0)),
                pl.BlockSpec((C_red, C), lambda n: (0, 0)),
            ],
            out_specs=pl.BlockSpec((nb, HW, C), lambda n: (n, 0, 0)),
        ),
        compiler_params=pltpu.CompilerParams(
            dimension_semantics=("parallel",),
            vmem_limit_bytes=_VMEM_LIMIT_BYTES,
        ),
        cost_estimate=cost,
    )(x, w1t, w2t)

    # Note: if a production (1, HW, C) slab ever exceeds the VMEM budget, the
    # right fallback is two full-lane-density passes (pooled-sum reduction over
    # HW tiles + a tiled scale pass) rather than shrinking the lane dimension.
    return jnp.transpose(out.reshape(N, H, W, C), (0, 3, 1, 2))


if __name__ == "__main__":
    # Small shapes consistent with the module: channels=8, reduction=4
    N, C, H, W = 2, 8, 8, 8
    reduction = 4
    C_red = C // reduction

    key = jax.random.PRNGKey(0)
    kx, k1, k2 = jax.random.split(key, 3)

    x = jax.random.normal(kx, (N, C, H, W), dtype=jnp.float32)
    # Deterministic synthetic Conv2d(kernel_size=1, bias=False) weights
    w1 = jax.random.normal(k1, (C_red, C, 1, 1), dtype=jnp.float32) * 0.1
    w2 = jax.random.normal(k2, (C, C_red, 1, 1), dtype=jnp.float32) * 0.1

    y = se_module(x, w1, w2)
    jax.block_until_ready(y)

    # Pure-JAX reference check of the same semantics
    pooled = jnp.mean(x, axis=(2, 3))                          # (N, C)
    h = jnp.maximum(pooled @ w1.reshape(C_red, C).T, 0.0)      # (N, C_red)
    s = jax.nn.sigmoid(h @ w2.reshape(C, C_red).T)             # (N, C)
    ref = x * s[:, :, None, None]
    assert jnp.allclose(y, ref, atol=1e-5, rtol=1e-5), "mismatch vs reference"

    print("KERNEL_OK")
</pallas_src>

<mosaic_0001>
module attributes {stable_mosaic.version = 11 : i64} {
  func.func @se_kernel(%arg0: i32, %arg1: memref<1x64x8xf32, #tpu.memory_space<vmem>>, %arg2: memref<8x2xf32, #tpu.memory_space<vmem>>, %arg3: memref<2x8xf32, #tpu.memory_space<vmem>>, %arg4: memref<1x64x8xf32, #tpu.memory_space<vmem>>) attributes {dimension_semantics = [#tpu.dimension_semantics<parallel>], iteration_bounds = array<i64: 2>, scalar_prefetch = 0 : i64, scratch_operands = 0 : i64, tpu.core_type = #tpu.core_type<tc>, window_params = [{transform_indices = @transform_0, window_bounds = array<i64: 1, 64, 8>}, {pipeline_mode = #tpu.pipeline_mode<synchronous>, transform_indices = @transform_1, window_bounds = array<i64: 8, 2>}, {pipeline_mode = #tpu.pipeline_mode<synchronous>, transform_indices = @transform_2, window_bounds = array<i64: 2, 8>}, {transform_indices = @transform_3, window_bounds = array<i64: 1, 64, 8>}]} {
    %c0 = arith.constant 0 : index
    %c0_0 = arith.constant 0 : index
    %c0_1 = arith.constant 0 : index
    %0 = vector.load %arg1[%c0, %c0_0, %c0_1] : memref<1x64x8xf32, #tpu.memory_space<vmem>>, vector<1x64x8xf32>
    %cst = arith.constant dense<0.000000e+00> : vector<1x8xf32>
    %1 = vector.multi_reduction <add>, %0, %cst [1] : vector<1x64x8xf32> to vector<1x8xf32>
    %cst_2 = arith.constant 1.562500e-02 : f32
    %2 = vector.broadcast %cst_2 : f32 to vector<1x8xf32>
    %3 = arith.mulf %1, %2 : vector<1x8xf32>
    %c0_3 = arith.constant 0 : index
    %c0_4 = arith.constant 0 : index
    %4 = vector.load %arg2[%c0_3, %c0_4] : memref<8x2xf32, #tpu.memory_space<vmem>>, vector<8x2xf32>
    %cst_5 = arith.constant dense<0.000000e+00> : vector<1x2xf32>
    %5 = tpu.matmul %3, %4, %cst_5 {dimension_numbers = #tpu.dot_dimension_numbers<[1], [0], [0], [1], [0, 0, 1, 1], [], []>} : vector<1x8xf32>, vector<8x2xf32>, vector<1x2xf32> -> vector<1x2xf32>
    %cst_6 = arith.constant 0.000000e+00 : f32
    %6 = vector.broadcast %cst_6 : f32 to vector<1x2xf32>
    %7 = arith.maximumf %5, %6 : vector<1x2xf32>
    %c0_7 = arith.constant 0 : index
    %c0_8 = arith.constant 0 : index
    %8 = vector.load %arg3[%c0_7, %c0_8] : memref<2x8xf32, #tpu.memory_space<vmem>>, vector<2x8xf32>
    %cst_9 = arith.constant dense<0.000000e+00> : vector<1x8xf32>
    %9 = tpu.matmul %7, %8, %cst_9 {dimension_numbers = #tpu.dot_dimension_numbers<[1], [0], [0], [1], [0, 0, 1, 1], [], []>} : vector<1x2xf32>, vector<2x8xf32>, vector<1x8xf32> -> vector<1x8xf32>
    %cst_10 = arith.constant 0.000000e+00 : f32
    %10 = vector.broadcast %cst_10 : f32 to vector<1x8xf32>
    %11 = arith.subf %10, %9 : vector<1x8xf32>
    %12 = math.exp %11 : vector<1x8xf32>
    %cst_11 = arith.constant 1.000000e+00 : f32
    %13 = vector.broadcast %cst_11 : f32 to vector<1x8xf32>
    %14 = arith.addf %13, %12 : vector<1x8xf32>
    %cst_12 = arith.constant 1.000000e+00 : f32
    %15 = vector.broadcast %cst_12 : f32 to vector<1x8xf32>
    %16 = arith.divf %15, %14 : vector<1x8xf32>
    %c0_13 = arith.constant 0 : index
    %c0_14 = arith.constant 0 : index
    %c0_15 = arith.constant 0 : index
    %17 = vector.load %arg1[%c0_13, %c0_14, %c0_15] : memref<1x64x8xf32, #tpu.memory_space<vmem>>, vector<1x64x8xf32>
    %18 = vector.shape_cast %16 : vector<1x8xf32> to vector<1x1x8xf32>
    %19 = vector.broadcast %18 : vector<1x1x8xf32> to vector<1x64x8xf32>
    %20 = arith.mulf %17, %19 : vector<1x64x8xf32>
    %c0_16 = arith.constant 0 : index
    %c0_17 = arith.constant 0 : index
    %c0_18 = arith.constant 0 : index
    %21 = vector.load %arg4[%c0_16, %c0_17, %c0_18] : memref<1x64x8xf32, #tpu.memory_space<vmem>>, vector<1x64x8xf32>
    tpu.vector_store %arg4[%c0_16, %c0_17, %c0_18], %20 {strides = array<i32>} : memref<1x64x8xf32, #tpu.memory_space<vmem>>, vector<1x64x8xf32>,
    return
  }
  func.func @transform_0(%arg0: i32) -> (i32, i32, i32) {
    %c0_i32 = arith.constant 0 : i32
    %c0_i32_0 = arith.constant 0 : i32
    %c0_i32_1 = arith.constant 0 : i32
    return %arg0, %c0_i32, %c0_i32_0 : i32, i32, i32
  }
  func.func @transform_1(%arg0: i32) -> (i32, i32) {
    %c0_i32 = arith.constant 0 : i32
    %c0_i32_0 = arith.constant 0 : i32
    %c0_i32_1 = arith.constant 0 : i32
    return %c0_i32, %c0_i32_0 : i32, i32
  }
  func.func @transform_2(%arg0: i32) -> (i32, i32) {
    %c0_i32 = arith.constant 0 : i32
    %c0_i32_0 = arith.constant 0 : i32
    %c0_i32_1 = arith.constant 0 : i32
    return %c0_i32, %c0_i32_0 : i32, i32
  }
  func.func @transform_3(%arg0: i32) -> (i32, i32, i32) {
    %c0_i32 = arith.constant 0 : i32
    %c0_i32_0 = arith.constant 0 : i32
    %c0_i32_1 = arith.constant 0 : i32
    return %arg0, %c0_i32, %c0_i32_0 : i32, i32, i32
  }
}

</mosaic_0001>

<bundles_post_ra>
// kernel: tpu_custom_call.1
= control target key start
LH: loop header
LB: loop body
LE: loop exit
PB: predicated region body
PF: predicated region fallthrough
CT: control target
= control target key end

     0   :  { %s511_s12 = smov 0   ;;  %s558_s0 = inlined_call_operand.vmem [shape: f32[2,64,8], index: 0, kind: input, shape index: {}]   ;;  %s559_s1 = inlined_call_operand.vmem [shape: f32[8,2], index: 1, kind: input, shape index: {}]   ;;  %s560_s2 = inlined_call_operand.vmem [shape: f32[2,8], index: 2, kind: input, shape index: {}]   ;;  %s561_s3 = inlined_call_operand.vmem [shape: f32[2,64,8], index: 3, kind: output, shape index: {}]  }
   0x1 LB: > { %s437_s13 = sadd.s32 4294967295, %s487_s12   ;;  %p441_p0 = scmp.ge.s32.totalorder %s487_s12, 1  ;;  %s487_s12 = sphi %s511_s12, %s13_s12  }
   0x2   : > { %p137_p1 = scmp.lt.s32.totalorder %s487_s12, 3 }
   0x4   : > { %p138_p2 = pnand %p441_p0, %p137_p1 }
   0x5   : > { %v202_v0 = vld [vmem:[%s559_s1] sm:$0xff] (!%p138_p2)  ;;  %p161_p3 = scmp.lt.s32.totalorder (!%p138_p2), %s437_s13, 1  ;;  %v489_v1 = vmov (!%p138_p2), 0.0   ;;  %vm490_vm0 = vmmov (!%p138_p2), 0   ;;  %vm179_vm1 = vcmask (!%p138_p2), 64512   ;;  %vm282_vm2 = vcmask (!%p138_p2), 1041408  }
   0x6   : > { %141 = sbr.rel (%p138_p2) target bundleno = 508 (0x1fc), region = 32  ;;  %457 = vmatprep.subr.mxu0 (!%p138_p2), %v489_v1  ;;  %459 = vmatprep.mubr.msk.f32.mxu0 (!%p138_p2), %vm490_vm0, %v489_v1  ;;  %v277_v32 = vld [vmem:[%s560_s2] sm:$0x3] (!%p138_p2)  ;;  %vm278_vm3 = vcmask (!%p138_p2), 15360   ;;  %v362_v42 = vlaneseq (!%p138_p2) }
   0x7   : > { %458 = vmatpush3.msra.mxu0 (!%p138_p2), %v202_v0  ;;  %462 = vmatprep.subr.mxu1 (!%p138_p2), %v489_v1 }
   0x8   : > { %464 = vmatprep.mubr.msk.f32.mxu1 (!%p138_p2), %vm490_vm0, %v489_v1  ;;  %463 = vmatpush3.msk.msra.mxu1 (!%p138_p2), %vm282_vm2, %v277_v32  ;;  %v363_v43 = vshrl.u32 (!%p138_p2), %v362_v42, 7 }
   0xa   : > { %v364_v44 = vsub.s32 (!%p138_p2), 0, %v363_v43 }
   0xd   : > { %s563_s13 = smov (!%p161_p3, %s437_s13), 1 }
   0xe   : > { %s451_s16 = sshll.u32 %s563_s13, 6 }
   0xf   : > { %s165_s19 = scalar_lea.vmem %s558_s0, %s451_s16  ;;  %s170_s24 = scalar_lea.vmem %s561_s3, %s451_s16 }
  0x10   : > { %v171_v2 = vld [vmem:[%s165_s19] sm:$0xff]  ;;  %v172_v3 = vld [vmem:[%s165_s19 + $0x8] sm:$0xff]  ;;  %v173_v4 = vld [vmem:[%s165_s19 + $0x10] sm:$0xff] }
  0x11   : > { %v174_v5 = vld [vmem:[%s165_s19 + $0x18] sm:$0xff]  ;;  %v180_v6 = vsel %vm179_vm1, %v171_v2, 0.0  ;;  %v181_v7 = vsel %vm179_vm1, %v172_v3, 0.0  ;;  %v183_v8 = vsel %vm179_vm1, %v173_v4, 0.0  ;;  %v175_v9 = vld [vmem:[%s165_s19 + $0x20] sm:$0xff]  ;;  %v176_v12 = vld [vmem:[%s165_s19 + $0x28] sm:$0xff] }
  0x12   : > { %v182_v10 = vadd.f32 %v181_v7, %v180_v6  ;;  %v185_v11 = vsel %vm179_vm1, %v174_v5, 0.0  ;;  %v187_v14 = vsel %vm179_vm1, %v175_v9, 0.0  ;;  %v177_v15 = vld [vmem:[%s165_s19 + $0x30] sm:$0xff]  ;;  %v189_v17 = vsel %vm179_vm1, %v176_v12, 0.0  ;;  %v178_v18 = vld [vmem:[%s165_s19 + $0x38] sm:$0xff] }
  0x13   : > { %v191_v20 = vsel %vm179_vm1, %v177_v15, 0.0  ;;  %v193_v22 = vsel %vm179_vm1, %v178_v18, 0.0 }
  0x14   : > { %v184_v13 = vadd.f32 %v183_v8, %v182_v10 }
  0x16   : > { %v186_v16 = vadd.f32 %v185_v11, %v184_v13 }
  0x18   : > { %v188_v19 = vadd.f32 %v187_v14, %v186_v16 }
  0x1a   : > { %v190_v21 = vadd.f32 %v189_v17, %v188_v19 }
  0x1c   : > { %v192_v23 = vadd.f32 %v191_v20, %v190_v21 }
  0x1e   : > { %v194_v24 = vadd.f32 %v193_v22, %v192_v23 }
  0x20   : > { %v195_v25 = vrot.slane %v194_v24, 4 }
  0x22   : > { %v196_v26 = vadd.f32 %v195_v25, %v194_v24 }
  0x24   : > { %v197_v27 = vrot.slane %v196_v26, 2 }
  0x26   : > { %v198_v28 = vadd.f32 %v197_v27, %v196_v26 }
  0x28   : > { %v199_v29 = vrot.slane %v198_v28, 1 }
  0x2a   : > { %v200_v30 = vadd.f32 %v199_v29, %v198_v28 }
  0x2c   : > { %v201_v31 = vmul.f32 0.015625, %v200_v30 }
  0x2e   : > { %460 = vmatmul.mubr.msk.f32.vlgmr.msra.gmra.mrb[0].mxu0 %vm179_vm1, %v201_v31 }
 0x101   : > { %v272_v33 = vpop.f32.mrb[0].mxu0 }
 0x102   : > { %v276_v34 = vmax.f32 %v272_v33, 0.0  ;;  %v461_v35 = vpop.f32.mrb[1].mxu0 }
 0x104   : > { %465 = vmatmul.mubr.msk.f32.vlgmr.msra.gmra.mrb[0].mxu1 %vm278_vm3, %v276_v34 }
 0x1d7   : > { %v352_v36 = vpop.f32.mrb[0].mxu1 }
 0x1d8   : > { %v356_v37 = vsub.f32 0.0, %v352_v36  ;;  %v466_v38 = vpop.f32.mrb[1].mxu1 }
 0x1da   : > { %v357_v39 = vmul.f32 1.442695, %v356_v37 }
 0x1dc   : > { %477 = vpow2.f32 %v357_v39 }
 0x1e6   : > { %v478_v40 = vpop.eup %477 }
 0x1e7   : > { %v359_v41 = vadd.f32 1.0, %v478_v40 }
 0x1e9   : > { %479 = vrcp.f32 %v359_v41 }
 0x1f3   : > { %v480_v45 = vpop.eup %479 }
 0x1f4   : > { %v365_v46 = vrot.slane %v480_v45, %v364_v44 }
 0x1f6   : > { %v366_v47 = vmul.f32 %v365_v46, %v171_v2  ;;  %v367_v48 = vmul.f32 %v365_v46, %v172_v3  ;;  %v368_v49 = vmul.f32 %v365_v46, %v173_v4  ;;  %v369_v50 = vmul.f32 %v365_v46, %v174_v5 }
 0x1f7   : > { %v370_v51 = vmul.f32 %v365_v46, %v175_v9  ;;  %v371_v52 = vmul.f32 %v365_v46, %v176_v12  ;;  %v372_v53 = vmul.f32 %v365_v46, %v177_v15  ;;  %v373_v54 = vmul.f32 %v365_v46, %v178_v18 }
 0x1f8   : > { %374 = vst.msk [vmem:[%s170_s24] sm:$0xff] %vm179_vm1, %v366_v47  ;;  %375 = vst.msk [vmem:[%s170_s24 + $0x8] sm:$0xff] %vm179_vm1, %v367_v48 }
 0x1f9   : > { %376 = vst.msk [vmem:[%s170_s24 + $0x10] sm:$0xff] %vm179_vm1, %v368_v49  ;;  %377 = vst.msk [vmem:[%s170_s24 + $0x18] sm:$0xff] %vm179_vm1, %v369_v50 }
 0x1fa   : > { %378 = vst.msk [vmem:[%s170_s24 + $0x20] sm:$0xff] %vm179_vm1, %v370_v51  ;;  %379 = vst.msk [vmem:[%s170_s24 + $0x28] sm:$0xff] %vm179_vm1, %v371_v52 }
 0x1fb   : > { %380 = vst.msk [vmem:[%s170_s24 + $0x30] sm:$0xff] %vm179_vm1, %v372_v53  ;;  %381 = vst.msk [vmem:[%s170_s24 + $0x38] sm:$0xff] %vm179_vm1, %v373_v54 }
 0x1fc PF: > { %s13_s12 = sadd.s32 1, %s487_s12  }
 0x1fd   : > { %p10_p4 = scmp.ge.s32.totalorder %s13_s12, 4  }
 0x1ff   :  { %12 = sbr.rel (!%p10_p4) target bundleno = 1 (0x1), region = 62 }

</bundles_post_ra>
